<compile_context>
chip_gen: v6e
topology: v6e:2x2x1
jax: 0.10.0
libtpu: 0.0.40
codegen_flags: <defaults>
</compile_context>

<pallas_src>
import jax
import jax.numpy as jnp
from jax.experimental import pallas as pl
from jax.experimental.pallas import tpu as pltpu

HIDDEN = 32    # hidden width from the module default
TB = 2048      # default batch tile: multiple of 128 lanes, ~step-overhead free


def mlp_kernel(x_ref, vecs_ref, w2_ref, w3_ref, b3_ref, o_ref):
    """Fused 3-layer MLP for one lane-major batch tile.

    Shapes (batch-on-lanes layout):
      x_ref    : (1, TB)
      vecs_ref : (H, 3)   columns = [w1, b1, b2]
      w2_ref   : (H, H)   (PyTorch (out, in) layout)
      w3_ref   : (1, H)   (Linear(H,1) weight as a row -> MXU matmul)
      b3_ref   : (1, 1)   scalar in SMEM
      o_ref    : (1, TB)
    """
    x = x_ref[...]                                          # (1, TB)
    w1 = vecs_ref[:, 0:1]                                   # (H, 1)
    b1 = vecs_ref[:, 1:2]                                   # (H, 1)
    b2 = vecs_ref[:, 2:3]                                   # (H, 1)

    # Layer 1: Linear(1, H) + ReLU as a VPU broadcast multiply-add (no MXU).
    h1 = jnp.maximum(w1 * x + b1, 0.0)                      # (H, TB)

    # Layer 2: Linear(H, H) + ReLU — dense 32x32 matmul on the MXU.
    h2 = jnp.dot(w2_ref[...], h1,
                 preferred_element_type=jnp.float32) + b2   # (H, TB)
    h2 = jnp.maximum(h2, 0.0)

    # Layer 3: Linear(H, 1) as a (1,H)@(H,TB) MXU matmul — frees the VPU/XLU
    # (no elementwise multiply + cross-sublane reduction on the critical unit).
    out = jnp.dot(w3_ref[...], h2,
                  preferred_element_type=jnp.float32) + b3_ref[0, 0]
    o_ref[...] = out.astype(o_ref.dtype)                    # (1, TB)


def _pallas_forward(x_t, params, num_tiles, tb):
    """x_t: (1, Np) lane-major input with Np = num_tiles * tb."""
    H = params["w2"].shape[0]
    Np = num_tiles * tb
    return pl.pallas_call(
        mlp_kernel,
        out_shape=jax.ShapeDtypeStruct((1, Np), jnp.float32),
        grid_spec=pl.GridSpec(
            grid=(num_tiles,),
            in_specs=[
                pl.BlockSpec((1, tb), lambda i: (0, i)),    # x tile (lane-dense)
                pl.BlockSpec((H, 3), lambda i: (0, 0)),     # packed w1|b1|b2
                pl.BlockSpec((H, H), lambda i: (0, 0)),     # w2
                pl.BlockSpec((1, H), lambda i: (0, 0)),     # w3 row
                pl.BlockSpec(memory_space=pltpu.MemorySpace.SMEM),  # b3 scalar
            ],
            out_specs=pl.BlockSpec((1, tb), lambda i: (0, i)),
        ),
        compiler_params=pltpu.CompilerParams(
            dimension_semantics=("parallel",),
            # Only needed for very large tiles (v5e's default scoped VMEM is
            # 16 MiB); at the default TB the footprint is well under 2 MiB.
            vmem_limit_bytes=(64 * 1024 * 1024 if tb > 4096 else None),
        ),
    )(x_t, params["vecs"], params["w2"], params["w3"], params["b3"])


def _select_tile(n, tb):
    """Pick a lane-multiple tile; keep >= 2 grid steps for v7x megacore."""
    if n >= 2 * 128:
        tb = min(tb, (n // 2) // 128 * 128)
    return max(tb, 128)


def contnet_forward(x, params, tb=TB):
    """x: (N, 1) float32. Returns (N, 1) float32."""
    N = x.shape[0]

    # Tiny batches: kernel launch overhead dominates; use the pure-XLA path.
    if N < 128:
        return reference_forward(x, params)

    tb = _select_tile(N, tb)
    num_tiles = pl.cdiv(N, tb)
    Np = num_tiles * tb

    if Np == N:
        # (N, 1) -> (1, N) is a free, contiguity-preserving reshape: no extra
        # HBM round trip in the wrapper.
        x_t = x.reshape(1, N)
    else:
        # Ragged tail: pad only the remainder.
        x_t = jnp.pad(x[:, 0], (0, Np - N)).reshape(1, Np)

    out_t = _pallas_forward(x_t, params, num_tiles, tb)     # (1, Np)

    if Np == N:
        return out_t.reshape(N, 1)                          # free reshape back
    return out_t[0, :N].reshape(N, 1)


def init_params(key, hidden=HIDDEN):
    """Deterministic init mimicking PyTorch Linear's U(-1/sqrt(fan_in), ...).

    Stored directly in the kernel's compute layout:
      vecs : (H, 3)  columns = [w1 (H,1), b1 (H,1), b2 (H,1)]
      w2   : (H, H)  (PyTorch (out, in) layout)
      w3   : (1, H)  (Linear(H,1) weight as a row)
      b3   : (1, 1)
    """
    k1, k2, k3, k4, k5, k6 = jax.random.split(key, 6)

    def uniform(k, shape, fan_in):
        bound = 1.0 / jnp.sqrt(float(fan_in))
        return jax.random.uniform(k, shape, jnp.float32, -bound, bound)

    w1 = uniform(k1, (hidden, 1), 1)
    b1 = uniform(k2, (hidden, 1), 1)
    w2 = uniform(k3, (hidden, hidden), hidden)
    b2 = uniform(k4, (hidden, 1), hidden)
    w3 = uniform(k5, (1, hidden), hidden)
    b3 = uniform(k6, (1, 1), hidden)

    return {
        "vecs": jnp.concatenate([w1, b1, b2], axis=1),      # (H, 3)
        "w2": w2,
        "w3": w3,
        "b3": b3,
    }


def reference_forward(x, p):
    """Pure-XLA reference in the standard (N, feature) layout."""
    w1 = p["vecs"][:, 0:1]
    b1 = p["vecs"][:, 1:2]
    b2 = p["vecs"][:, 2:3]
    h = jnp.maximum(x @ w1.T + b1.T, 0.0)                   # (N, H)
    h = jnp.maximum(h @ p["w2"].T + b2.T, 0.0)              # (N, H)
    return h @ p["w3"].T + p["b3"]                          # (N, 1)


if __name__ == "__main__":
    key = jax.random.PRNGKey(0)
    pkey, xkey = jax.random.split(key)

    params = init_params(pkey, HIDDEN)

    N = 4096  # 2 grid steps at TB=2048 -> both v7x TensorCores get work
    x = jax.random.normal(xkey, (N, 1), dtype=jnp.float32)

    out = contnet_forward(x, params)
    out = jax.block_until_ready(out)

    ref = reference_forward(x, params)
    assert out.shape == (N, 1)
    assert jnp.allclose(out, ref, atol=1e-4, rtol=1e-5), "mismatch vs reference"

    print("KERNEL_OK")
</pallas_src>

<mosaic_0001>
module attributes {stable_mosaic.version = 11 : i64} {
  func.func @mlp_kernel(%arg0: i32, %arg1: memref<1x2048xf32, #tpu.memory_space<vmem>>, %arg2: memref<32x3xf32, #tpu.memory_space<vmem>>, %arg3: memref<32x32xf32, #tpu.memory_space<vmem>>, %arg4: memref<1x32xf32, #tpu.memory_space<vmem>>, %arg5: memref<1x1xf32, #tpu.memory_space<smem>>, %arg6: memref<1x2048xf32, #tpu.memory_space<vmem>>) attributes {dimension_semantics = [#tpu.dimension_semantics<parallel>], iteration_bounds = array<i64: 2>, scalar_prefetch = 0 : i64, scratch_operands = 0 : i64, tpu.core_type = #tpu.core_type<tc>, window_params = [{transform_indices = @transform_0, window_bounds = array<i64: 1, 2048>}, {pipeline_mode = #tpu.pipeline_mode<synchronous>, transform_indices = @transform_1, window_bounds = array<i64: 32, 3>}, {pipeline_mode = #tpu.pipeline_mode<synchronous>, transform_indices = @transform_2, window_bounds = array<i64: 32, 32>}, {pipeline_mode = #tpu.pipeline_mode<synchronous>, transform_indices = @transform_3, window_bounds = array<i64: 1, 32>}, {transform_indices = @transform_4, window_bounds = array<i64: 1, 1>}, {transform_indices = @transform_5, window_bounds = array<i64: 1, 2048>}]} {
    %c0 = arith.constant 0 : index
    %c0_0 = arith.constant 0 : index
    %0 = vector.load %arg1[%c0, %c0_0] : memref<1x2048xf32, #tpu.memory_space<vmem>>, vector<1x2048xf32>
    %c0_1 = arith.constant 0 : index
    %c0_2 = arith.constant 0 : index
    %1 = vector.load %arg2[%c0_1, %c0_2] : memref<32x3xf32, #tpu.memory_space<vmem>>, vector<32x1xf32>
    %c0_3 = arith.constant 0 : index
    %c1 = arith.constant 1 : index
    %2 = vector.load %arg2[%c0_3, %c1] : memref<32x3xf32, #tpu.memory_space<vmem>>, vector<32x1xf32>
    %c0_4 = arith.constant 0 : index
    %c2 = arith.constant 2 : index
    %3 = vector.load %arg2[%c0_4, %c2] : memref<32x3xf32, #tpu.memory_space<vmem>>, vector<32x1xf32>
    %4 = vector.broadcast %1 : vector<32x1xf32> to vector<32x2048xf32>
    %5 = vector.broadcast %0 : vector<1x2048xf32> to vector<32x2048xf32>
    %6 = arith.mulf %4, %5 : vector<32x2048xf32>
    %7 = vector.broadcast %2 : vector<32x1xf32> to vector<32x2048xf32>
    %8 = arith.addf %6, %7 : vector<32x2048xf32>
    %cst = arith.constant 0.000000e+00 : f32
    %9 = vector.broadcast %cst : f32 to vector<32x2048xf32>
    %10 = arith.maximumf %8, %9 : vector<32x2048xf32>
    %c0_5 = arith.constant 0 : index
    %c0_6 = arith.constant 0 : index
    %11 = vector.load %arg3[%c0_5, %c0_6] : memref<32x32xf32, #tpu.memory_space<vmem>>, vector<32x32xf32>
    %cst_7 = arith.constant dense<0.000000e+00> : vector<32x2048xf32>
    %12 = tpu.matmul %11, %10, %cst_7 {dimension_numbers = #tpu.dot_dimension_numbers<[1], [0], [0], [1], [0, 0, 1, 1], [], []>} : vector<32x32xf32>, vector<32x2048xf32>, vector<32x2048xf32> -> vector<32x2048xf32>
    %13 = vector.broadcast %3 : vector<32x1xf32> to vector<32x2048xf32>
    %14 = arith.addf %12, %13 : vector<32x2048xf32>
    %cst_8 = arith.constant 0.000000e+00 : f32
    %15 = vector.broadcast %cst_8 : f32 to vector<32x2048xf32>
    %16 = arith.maximumf %14, %15 : vector<32x2048xf32>
    %c0_9 = arith.constant 0 : index
    %c0_10 = arith.constant 0 : index
    %17 = vector.load %arg4[%c0_9, %c0_10] : memref<1x32xf32, #tpu.memory_space<vmem>>, vector<1x32xf32>
    %cst_11 = arith.constant dense<0.000000e+00> : vector<1x2048xf32>
    %18 = tpu.matmul %17, %16, %cst_11 {dimension_numbers = #tpu.dot_dimension_numbers<[1], [0], [0], [1], [0, 0, 1, 1], [], []>} : vector<1x32xf32>, vector<32x2048xf32>, vector<1x2048xf32> -> vector<1x2048xf32>
    %c0_12 = arith.constant 0 : index
    %c0_13 = arith.constant 0 : index
    %19 = memref.load %arg5[%c0_12, %c0_13] : memref<1x1xf32, #tpu.memory_space<smem>>
    %20 = vector.broadcast %19 : f32 to vector<1x2048xf32>
    %21 = arith.addf %18, %20 : vector<1x2048xf32>
    %c0_14 = arith.constant 0 : index
    %c0_15 = arith.constant 0 : index
    %22 = vector.load %arg6[%c0_14, %c0_15] : memref<1x2048xf32, #tpu.memory_space<vmem>>, vector<1x2048xf32>
    tpu.vector_store %arg6[%c0_14, %c0_15], %21 {strides = array<i32>} : memref<1x2048xf32, #tpu.memory_space<vmem>>, vector<1x2048xf32>,
    return
  }
  func.func @transform_0(%arg0: i32) -> (i32, i32) {
    %c0_i32 = arith.constant 0 : i32
    %c0_i32_0 = arith.constant 0 : i32
    return %c0_i32, %arg0 : i32, i32
  }
  func.func @transform_1(%arg0: i32) -> (i32, i32) {
    %c0_i32 = arith.constant 0 : i32
    %c0_i32_0 = arith.constant 0 : i32
    %c0_i32_1 = arith.constant 0 : i32
    return %c0_i32, %c0_i32_0 : i32, i32
  }
  func.func @transform_2(%arg0: i32) -> (i32, i32) {
    %c0_i32 = arith.constant 0 : i32
    %c0_i32_0 = arith.constant 0 : i32
    %c0_i32_1 = arith.constant 0 : i32
    return %c0_i32, %c0_i32_0 : i32, i32
  }
  func.func @transform_3(%arg0: i32) -> (i32, i32) {
    %c0_i32 = arith.constant 0 : i32
    %c0_i32_0 = arith.constant 0 : i32
    %c0_i32_1 = arith.constant 0 : i32
    return %c0_i32, %c0_i32_0 : i32, i32
  }
  func.func @transform_4(%arg0: i32) -> (i32, i32) {
    %c0_i32 = arith.constant 0 : i32
    %c0_i32_0 = arith.constant 0 : i32
    %c0_i32_1 = arith.constant 0 : i32
    return %c0_i32, %c0_i32_0 : i32, i32
  }
  func.func @transform_5(%arg0: i32) -> (i32, i32) {
    %c0_i32 = arith.constant 0 : i32
    %c0_i32_0 = arith.constant 0 : i32
    return %c0_i32, %arg0 : i32, i32
  }
}

</mosaic_0001>

<bundles_post_ra>
// kernel: tpu_custom_call.1
= control target key start
LH: loop header
LB: loop body
LE: loop exit
PB: predicated region body
PF: predicated region fallthrough
CT: control target
= control target key end

     0   :  { %s3021_s0 = inlined_call_operand.vmem [shape: f32[1,4096], index: 0, kind: input, shape index: {}]   ;;  %s3022_s1 = inlined_call_operand.vmem [shape: f32[32,3], index: 1, kind: input, shape index: {}]   ;;  %s3023_s2 = inlined_call_operand.hbm [shape: f32[32,32], index: 2, kind: input, shape index: {}]   ;;  %s3024_s3 = inlined_call_operand.vmem [shape: f32[1,32], index: 3, kind: input, shape index: {}]   ;;  %s3025_s4 = inlined_call_operand.<no memory space> [shape: f32[1,1], index: 4, kind: input, shape index: {}]   ;;  %s3026_s5 = inlined_call_operand.hbm [shape: f32[1,4096], index: 5, kind: output, shape index: {}]  }
   0x1   :  { %10 = sst [smem:[#allocation2]] %s3025_s4 }
   0x2   :  { %11 = vsyncpa [#allocation4], 0 }
   0x3   :  { %12 = vsyncpa [#allocation5], 0 }
   0x4   :  { %14 = vsyncpa [#allocation5 + $0x1], 0  ;;  %s2391_s20 = smov 0   ;;  %s2393_s21 = smov 0  }
   0x5   :  { %s2395_s22 = smov 0   ;;  %s2397_s23 = smov 0  }
   0x6 LB: > { %s2412_s4 = sadd.s32 4294967295, %s2347_s23   ;;  %s2139_s24 = sadd.s32 4294967294, %s2347_s23   ;;  %s2347_s23 = sphi %s2397_s23, %s3034_s23   ;;  %s2343_s22 = sphi %s2395_s22, %s3033_s22   ;;  %s2339_s21 = sphi %s2393_s21, %s3032_s21   ;;  %s2335_s20 = sphi %s2391_s20, %s3031_s20  }
   0x7   : > { %s2416_s25 = sadd.s32 1, %s2347_s23   ;;  %s137_s26 = sadd.s32 1, %s2343_s22 }
   0x8   : > { %s134_s27 = ssub.s32 %s2347_s23, %s2416_s25  ;;  %p147_p0 = scmp.ne.s32.totalorder %s2343_s22, %s2339_s21 }
   0x9   : > { %p135_p1 = scmp.eq.s32.totalorder %s134_s27, 0  ;;  %p148_p2 = scmp.eq.s32.totalorder %s2412_s4, 1 }
   0xa   : > { %p153_p3 = scmp.ne.s32.totalorder %s2339_s21, %s2335_s20  ;;  %p154_p4 = scmp.eq.s32.totalorder %s2139_s24, 1 }
   0xb   : > { %s2427_s28 = scalar_select %p135_p1, %s2343_s22, %s137_s26  }
   0xc   : > { %p2429_p5 = por %p148_p2, %p147_p0  ;;  %p2433_p6 = por %p154_p4, %p153_p3 }
   0xd   : > { %p2140_p7 = scmp.ge.s32.totalorder %s2347_s23, 1  ;;  %p161_p8 = scmp.lt.s32.totalorder %s2347_s23, 3 }
   0xe   : > { %s3028_s30 = scalar_select %p2433_p6, 1, 0 }
   0xf   : > { %p2207_p9 = scmp.eq.s32.totalorder %s2412_s4, 0  ;;  %p2440_p10 = pnand %p2140_p7, %p161_p8 }
  0x10   : > { %s2349_s7 = smov [#allocation3]  }
  0x11   : > { %s176_s8 = sshll.u32 %s2349_s7, 4  ;;  %p2199_p11 = pneg %p2440_p10  ;;  %s177_s8 = int_to_ptr.vmem [resolvable:$true] %s176_s8 }
  0x12   : > { %s2268_s9 = scalar_lea.vmem %s177_s8, 512  ;;  %p2276_p3 = scmp.lt.s32.totalorder %s177_s8, %s177_s8 }
  0x13   : > { %p2200_p12 = pnand %p2207_p9, %p2199_p11  ;;  %p2269_p0 = scmp.ne.s32.totalorder %s177_s8, %s2268_s9 }
  0x14   : > { %p2277_p4 = scmp.lt.s32.totalorder %s2268_s9, %s2268_s9 }
  0x15   : > { %p2259_p13 = pneg %p2200_p12 }
  0x16   : > { %p2278_p6 = por %p2277_p4, %p2276_p3 }
  0x17   : > { %p2271_p1 = pnand %p2269_p0, %p2259_p13 }
  0x19   : > { %p2272_p2 = pneg %p2271_p1 }
  0x1b   : > { %p2279_p7 = pnand %p2278_p6, %p2272_p2 }
  0x1d   : > { %2282 = shalt.err (!%p2279_p7)
}
  0x1e   : > { %s2350_s10 = smov 128   ;;  %s2351_s11 = smov 8  }
  0x1f   : > { %2202 = dma.hbm_to_vmem [thread:$0]  (!%p2200_p12), %s3023_s2, 512, %s177_s8, [#allocation4], %s2350_s10, %s2350_s10, %s2351_s11  }
  0x20   : > { %206 = sbr.rel (%p2440_p10) target bundleno = 684 (0x2ac), region = 40 }
  0x25   : > { %2326 = dma.done.wait (%p2207_p9), [#allocation4], 512  }
  0x26   : > { %2328 = vsyncadd (%p2207_p9), [#allocation4], 4294966784  ;;  %v2352_v0 = vmov 1   ;;  %v2353_v1 = vmov 0   ;;  %v244_v2 = vld [vmem:[%s3022_s1 + $0x18] sm:$0xff]  ;;  %v243_v3 = vld [vmem:[%s3022_s1 + $0x10] sm:$0xff]  ;;  %v267_v8 = vlaneseq }
  0x27   : > { %2251 = vset.pattern.permute.xlu1 %v2352_v0  ;;  %2250 = vset.pattern.permute.xlu0 %v2353_v1  ;;  %v242_v4 = vld [vmem:[%s3022_s1 + $0x8] sm:$0xff]  ;;  %v241_v5 = vld [vmem:[%s3022_s1] sm:$0xff]  ;;  %v2354_v6 = vmov 0.0   ;;  %v2355_v7 = vmov 2   ;;  %s2146_s27 = sshll.u32 %s2412_s4, 4  ;;  %vm575_vm0 = vcmask 261120  }
  0x28   : > { %424 = vperm.xlu1 %2251, %v244_v2   ;;  %262 = vperm.xlu0 %2250, %v244_v2   ;;  %p234_p6 = scmp.lt.s32.totalorder %s2146_s27, 31  ;;  %v2472_v9 = vshrl.u32 %v267_v8, 7  ;;  %s1365_s11 = sld [smem:[#allocation2]] }
  0x29   : > { %652 = vmatprep.mubr.f32.mxu0 %v2354_v6  ;;  %741 = vmatprep.mubr.f32.mxu1 %v2354_v6  ;;  %s230_s12 = sand.u32 1, %s2339_s21   ;;  %s2192_s15 = sshll.u32 %s2412_s4, 8 }
  0x2a   : > { %s3036_s27 = smov (!%p234_p6, %s2146_s27), 31  ;;  %v273_v10 = vsub.s32 1, %v2472_v9  ;;  %v281_v11 = vsub.s32 3, %v2472_v9  ;;  %v269_v12 = vsub.s32 0, %v2472_v9  ;;  %v277_v13 = vsub.s32 2, %v2472_v9  ;;  %s2145_s13 = sshll.u32 %s230_s12, 4 }
  0x2b   : > { %s236_s8 = scalar_lea.vmem %s3021_s0, %s3036_s27  ;;  %v289_v15 = vsub.s32 5, %v2472_v9  ;;  %v297_v16 = vsub.s32 7, %v2472_v9  ;;  %v285_v21 = vsub.s32 4, %v2472_v9  ;;  %v293_v26 = vsub.s32 6, %v2472_v9  ;;  %s2981_s14 = scalar_lea.vmem [#allocation6], %s2145_s13 }
  0x2c   : > { %2252 = vset.pattern.permute.xlu1 %v2353_v1  ;;  %257 = vperm.xlu0 %2250, %v243_v3   ;;  %v239_v14 = vld [vmem:[%s236_s8] sm:$0xff]  ;;  %v2518_v37 = vld [vmem:[%s236_s8 + $0x8] sm:$0xff]  ;;  %s2071_s16 = sshll.u32 %s2981_s14, 4  ;;  %s2069_s19 = scalar_lea.hbm %s3026_s5, %s2192_s15  ;;  %s2072_s16 = int_to_ptr.vmem [resolvable:$true] %s2071_s16 }
  0x2d   : > { %252 = vperm.xlu1 %2252, %v242_v4   ;;  %v274_v17 = vrot.slane %v239_v14, %v273_v10  ;;  %v282_v18 = vrot.slane %v239_v14, %v281_v11  ;;  %v270_v19 = vrot.slane %v239_v14, %v269_v12  ;;  %v2487_v20 = vrot.slane %v239_v14, %v277_v13  ;;  %s2057_s24 = scalar_lea.sflag [#allocation5], %s230_s12  ;;  %s2283_s26 = scalar_lea.vmem %s2072_s16, 256 }
  0x2e   : > { %v2496_v24 = vrot.slane %v239_v14, %v289_v15  ;;  %v2500_v25 = vrot.slane %v239_v14, %v297_v16  ;;  %v2510_v31 = vrot.slane %v239_v14, %v285_v21  ;;  %v2526_v40 = vrot.slane %v239_v14, %v293_v26  ;;  %p2284_p8 = scmp.ne.s32.totalorder %s2072_s16, %s2283_s26  ;;  %s2357_s27 = smov [#allocation6]  }
  0x2f   : > { %v2534_v48 = vrot.slane %v2518_v37, %v273_v10  ;;  %v2553_v57 = vrot.slane %v2518_v37, %v281_v11  ;;  %s2287_s6 = sshll.u32 %s2357_s27, 4  ;;  %s2288_s6 = int_to_ptr.vmem [resolvable:$false] %s2287_s6 }
  0x30   : > { %2253 = vset.pattern.permute.xlu0 %v2352_v0  ;;  %p2285_p9 = pnand %p2284_p8, %p2429_p5  ;;  %s2289_s4 = scalar_lea.vmem %s2288_s6, 512 }
  0x31   : > { %420 = vperm.xlu0 %2253, %v243_v3   ;;  %247 = vperm.xlu1 %2252, %v241_v5   ;;  %p2290_p11 = scmp.lt.s32.totalorder %s2072_s16, %s2288_s6  ;;  %p2291_p12 = scmp.lt.s32.totalorder %s2289_s4, %s2283_s26 }
  0x32   : > { %p2286_p10 = pneg %p2285_p9 }
  0x33   : > { %p2292_p13 = por %p2291_p12, %p2290_p11 }
  0x35   : > { %412 = vperm.xlu0 %2253, %v241_v5   ;;  %2254 = vset.pattern.permute.xlu1 %v2352_v0  ;;  %p2293_p0 = pnand %p2292_p13, %p2286_p10 }
  0x36   : > { %416 = vperm.xlu1 %2254, %v242_v4  }
  0x39   : > { %2256 = vset.pattern.permute.xlu0 %v2355_v7 }
  0x3a   : > { %2255 = vset.pattern.permute.xlu1 %v2355_v7  ;;  %568 = vperm.xlu0 %2256, %v243_v3  }
  0x3b   : > { %572 = vperm.xlu1 %2255, %v244_v2  }
  0x3f   : > { %564 = vperm.xlu1 %2255, %v242_v4  }
  0x43   : > { %560 = vperm.xlu1 %2255, %v241_v5  }
  0xa3   : > { %v2490_v22 = vpop.permute.xlu1 %424  ;;  %v2492_v23 = vpop.permute.xlu0 %262 }
  0xa4   : > { %v396_v27 = vmul.f32 %v274_v17, %v2492_v23  ;;  %v398_v28 = vmul.f32 %v282_v18, %v2492_v23  ;;  %v395_v29 = vmul.f32 %v270_v19, %v2492_v23  ;;  %v397_v30 = vmul.f32 %v2487_v20, %v2492_v23 }
  0xa5   : > { %v400_v38 = vmul.f32 %v2496_v24, %v2492_v23  ;;  %v402_v39 = vmul.f32 %v2500_v25, %v2492_v23  ;;  %v399_v47 = vmul.f32 %v2510_v31, %v2492_v23  ;;  %v401_v56 = vmul.f32 %v2526_v40, %v2492_v23 }
  0xa6   : > { %v476_v32 = vadd.f32 %v2490_v22, %v396_v27  ;;  %v478_v33 = vadd.f32 %v2490_v22, %v398_v28  ;;  %v475_v34 = vadd.f32 %v2490_v22, %v395_v29  ;;  %v477_v35 = vadd.f32 %v2490_v22, %v397_v30 }
  0xa7   : > { %v2516_v36 = vpop.permute.xlu0 %257  ;;  %v2545_v54 = vadd.f32 %v2490_v22, %v400_v38  ;;  %v2548_v55 = vadd.f32 %v2490_v22, %v402_v39  ;;  %v2563_v1 = vadd.f32 %v2490_v22, %v399_v47 }
  0xa8   : > { %v2528_v41 = vpop.permute.xlu1 %252  ;;  %v540_v42 = vmax.f32 %v476_v32, 0.0  ;;  %v542_v43 = vmax.f32 %v478_v33, 0.0  ;;  %v539_v44 = vmax.f32 %v475_v34, 0.0  ;;  %v541_v45 = vmax.f32 %v477_v35, 0.0 }
  0xa9   : > { %v380_v46 = vmul.f32 %v274_v17, %v2516_v36  ;;  %v382_v49 = vmul.f32 %v282_v18, %v2516_v36  ;;  %v379_v50 = vmul.f32 %v270_v19, %v2516_v36  ;;  %v381_v51 = vmul.f32 %v2487_v20, %v2516_v36 }
  0xaa   : > { %612 = vmatprep.subr.mxu0 %v540_v42  ;;  %701 = vmatprep.subr.mxu1 %v542_v43  ;;  %v364_v62 = vmul.f32 %v274_v17, %v2528_v41  ;;  %v366_v8 = vmul.f32 %v282_v18, %v2528_v41  ;;  %v363_v10 = vmul.f32 %v270_v19, %v2528_v41 }
  0xab   : > { %613 = vmatpush1.msra.mxu0 %v539_v44  ;;  %702 = vmatpush1.msra.mxu1 %v541_v45  ;;  %v365_v11 = vmul.f32 %v2487_v20, %v2528_v41  ;;  %v481_v34 = vadd.f32 %v2490_v22, %v401_v56  ;;  %v384_v35 = vmul.f32 %v2496_v24, %v2516_v36  ;;  %v544_v44 = vmax.f32 %v2545_v54, 0.0  ;;  %v2595_v54 = vld [vmem:[#allocation3] sm:$0xff] }
  0xac   : > { %v2540_v52 = vpop.permute.xlu0 %420  ;;  %v2542_v53 = vpop.permute.xlu1 %247  ;;  %v386_v45 = vmul.f32 %v2500_v25, %v2516_v36 }
  0xad   : > { %v460_v58 = vadd.f32 %v2540_v52, %v380_v46  ;;  %v462_v59 = vadd.f32 %v2540_v52, %v382_v49  ;;  %v459_v60 = vadd.f32 %v2540_v52, %v379_v50  ;;  %v461_v61 = vadd.f32 %v2540_v52, %v381_v51 }
  0xae   : > { %v348_v63 = vmul.f32 %v274_v17, %v2542_v53  ;;  %v350_v0 = vmul.f32 %v282_v18, %v2542_v53  ;;  %v347_v14 = vmul.f32 %v270_v19, %v2542_v53  ;;  %v349_v29 = vmul.f32 %v2487_v20, %v2542_v53 }
  0xaf   : > { %v524_v2 = vmax.f32 %v460_v58, 0.0  ;;  %v526_v3 = vmax.f32 %v462_v59, 0.0  ;;  %v523_v4 = vmax.f32 %v459_v60, 0.0  ;;  %v525_v5 = vmax.f32 %v461_v61, 0.0 }
  0xb0   : > { %v2565_v7 = vpop.permute.xlu0 %412  ;;  %v383_v46 = vmul.f32 %v2510_v31, %v2516_v36  ;;  %v464_v50 = vadd.f32 %v2540_v52, %v384_v35  ;;  %v385_v51 = vmul.f32 %v2526_v40, %v2516_v36  ;;  %v546_v59 = vmax.f32 %v2548_v55, 0.0 }
  0xb1   : > { %v2572_v17 = vpop.permute.xlu1 %416  ;;  %614 = vmatprep.subr.mxu0 %v524_v2  ;;  %703 = vmatprep.subr.mxu1 %v526_v3  ;;  %v428_v27 = vadd.f32 %v2565_v7, %v348_v63  ;;  %v430_v28 = vadd.f32 %v2565_v7, %v350_v0  ;;  %v427_v33 = vadd.f32 %v2565_v7, %v347_v14  ;;  %v543_v61 = vmax.f32 %v2563_v1, 0.0 }
  0xb2   : > { %615 = vmatpush1.msra.mxu0 %v523_v4  ;;  %704 = vmatpush1.msra.mxu1 %v525_v5  ;;  %v444_v18 = vadd.f32 %v2572_v17, %v364_v62  ;;  %v446_v30 = vadd.f32 %v2572_v17, %v366_v8  ;;  %v443_v32 = vadd.f32 %v2572_v17, %v363_v10  ;;  %v545_v2 = vmax.f32 %v481_v34, 0.0 }
  0xb3   : > { %v445_v19 = vadd.f32 %v2572_v17, %v365_v11  ;;  %v429_v42 = vadd.f32 %v2565_v7, %v349_v29  ;;  %v492_v47 = vmax.f32 %v428_v27, 0.0  ;;  %v494_v49 = vmax.f32 %v430_v28, 0.0 }
  0xb4   : > { %v508_v38 = vmax.f32 %v444_v18, 0.0  ;;  %v510_v20 = vmax.f32 %v446_v30, 0.0  ;;  %v507_v39 = vmax.f32 %v443_v32, 0.0  ;;  %v491_v56 = vmax.f32 %v427_v33, 0.0  ;;  %v2626_v32 = vld [vmem:[#allocation3 + $0x8] sm:$0xff] }
  0xb5   : > { %v509_v43 = vmax.f32 %v445_v19, 0.0  ;;  %v493_v58 = vmax.f32 %v429_v42, 0.0  ;;  %v466_v60 = vadd.f32 %v2540_v52, %v386_v45  ;;  %v463_v62 = vadd.f32 %v2540_v52, %v383_v46 }
  0xb6   : > { %616 = vmatprep.subr.mxu0 %v508_v38  ;;  %705 = vmatprep.subr.mxu1 %v510_v20  ;;  %v465_v63 = vadd.f32 %v2540_v52, %v385_v51  ;;  %v368_v0 = vmul.f32 %v2496_v24, %v2528_v41  ;;  %v370_v3 = vmul.f32 %v2500_v25, %v2528_v41  ;;  %v528_v1 = vmax.f32 %v464_v50, 0.0 }
  0xb7   : > { %617 = vmatpush1.msra.mxu0 %v507_v39  ;;  %706 = vmatpush1.msra.mxu1 %v509_v43  ;;  %v367_v55 = vmul.f32 %v2510_v31, %v2528_v41  ;;  %v369_v4 = vmul.f32 %v2526_v40, %v2528_v41  ;;  %v352_v8 = vmul.f32 %v2496_v24, %v2542_v53  ;;  %v530_v11 = vmax.f32 %v466_v60, 0.0 }
  0xb8   : > { %618 = vmatprep.subr.mxu0 %v492_v47  ;;  %707 = vmatprep.subr.mxu1 %v494_v49  ;;  %v448_v5 = vadd.f32 %v2572_v17, %v368_v0  ;;  %v354_v10 = vmul.f32 %v2500_v25, %v2542_v53  ;;  %v450_v14 = vadd.f32 %v2572_v17, %v370_v3  ;;  %v527_v29 = vmax.f32 %v463_v62, 0.0  ;;  %v2654_v49 = vld [vmem:[#allocation3 + $0x10] sm:$0xff] }
  0xb9   : > { %619 = vmatpush1.msra.mxu0 %v491_v56  ;;  %708 = vmatpush1.msra.mxu1 %v493_v58  ;;  %v447_v27 = vadd.f32 %v2572_v17, %v367_v55  ;;  %v449_v28 = vadd.f32 %v2572_v17, %v369_v4  ;;  %v432_v18 = vadd.f32 %v2565_v7, %v352_v8  ;;  %v529_v25 = vmax.f32 %v465_v63, 0.0 }
  0xba   : > { %2147 = vmatmul.mubr.msk.f32.vlgmr.msra.gmra.mxu0 %vm575_vm0, %v2595_v54  ;;  %2151 = vmatmul.mubr.msk.f32.vlgmr.msra.gmra.mxu1 %vm575_vm0, %v2595_v54  ;;  %v434_v30 = vadd.f32 %v2565_v7, %v354_v10  ;;  %v351_v24 = vmul.f32 %v2510_v31, %v2542_v53  ;;  %v353_v19 = vmul.f32 %v2526_v40, %v2542_v53  ;;  %v512_v40 = vmax.f32 %v448_v5, 0.0 }
  0xbb   : > { %790 = vmatprep.subr.mxu0 %v544_v44  ;;  %879 = vmatprep.subr.mxu1 %v546_v59  ;;  %v404_v33 = vmul.f32 %v2534_v48, %v2492_v23  ;;  %v406_v34 = vmul.f32 %v2553_v57, %v2492_v23  ;;  %v2637_v35 = vrot.slane %v2518_v37, %v269_v12  ;;  %v514_v38 = vmax.f32 %v450_v14, 0.0 }
  0xbc   : > { %791 = vmatpush1.msra.mxu0 %v543_v61  ;;  %880 = vmatpush1.msra.mxu1 %v545_v2  ;;  %v2642_v31 = vrot.slane %v2518_v37, %v277_v13  ;;  %v431_v20 = vadd.f32 %v2565_v7, %v351_v24  ;;  %v433_v39 = vadd.f32 %v2565_v7, %v353_v19  ;;  %v511_v12 = vmax.f32 %v447_v27, 0.0  ;;  %v2670_v61 = vld [vmem:[#allocation3 + $0x18] sm:$0xff] }
  0xbd   : > { %792 = vmatprep.subr.mxu0 %v528_v1  ;;  %881 = vmatprep.subr.mxu1 %v530_v11  ;;  %v513_v13 = vmax.f32 %v449_v28, 0.0  ;;  %v496_v42 = vmax.f32 %v432_v18, 0.0  ;;  %v498_v43 = vmax.f32 %v434_v30, 0.0  ;;  %v484_v44 = vadd.f32 %v2490_v22, %v404_v33 }
  0xbe   : > { %658 = vmatprep.mubr.f32.mxu0 %v2354_v6  ;;  %747 = vmatprep.mubr.f32.mxu1 %v2354_v6  ;;  %v486_v45 = vadd.f32 %v2490_v22, %v406_v34  ;;  %v495_v46 = vmax.f32 %v431_v20, 0.0  ;;  %v497_v47 = vmax.f32 %v433_v39, 0.0  ;;  %v403_v50 = vmul.f32 %v2637_v35, %v2492_v23 }
  0xbf   : > { %793 = vmatpush1.msra.mxu0 %v527_v29  ;;  %882 = vmatpush1.msra.mxu1 %v529_v25  ;;  %v405_v51 = vmul.f32 %v2642_v31, %v2492_v23  ;;  %v548_v56 = vmax.f32 %v484_v44, 0.0  ;;  %v388_v59 = vmul.f32 %v2534_v48, %v2516_v36  ;;  %v390_v60 = vmul.f32 %v2553_v57, %v2516_v36 }
  0xc0   : > { %2148 = vmatmul.mubr.msk.f32.gmra.mxu0 %vm575_vm0, %v2626_v32  ;;  %2152 = vmatmul.mubr.msk.f32.gmra.mxu1 %vm575_vm0, %v2626_v32  ;;  %v550_v58 = vmax.f32 %v486_v45, 0.0  ;;  %v483_v62 = vadd.f32 %v2490_v22, %v403_v50  ;;  %v387_v3 = vmul.f32 %v2637_v35, %v2516_v36  ;;  %v389_v55 = vmul.f32 %v2642_v31, %v2516_v36 }
  0xc1   : > { %794 = vmatprep.subr.mxu0 %v512_v40  ;;  %883 = vmatprep.subr.mxu1 %v514_v38  ;;  %v485_v63 = vadd.f32 %v2490_v22, %v405_v51  ;;  %v468_v0 = vadd.f32 %v2540_v52, %v388_v59  ;;  %v470_v2 = vadd.f32 %v2540_v52, %v390_v60 }
  0xc2   : > { %795 = vmatpush1.msra.mxu0 %v511_v12  ;;  %884 = vmatpush1.msra.mxu1 %v513_v13  ;;  %v2685_v4 = vrot.slane %v2518_v37, %v289_v15  ;;  %v467_v1 = vadd.f32 %v2540_v52, %v387_v3  ;;  %v372_v5 = vmul.f32 %v2534_v48, %v2528_v41  ;;  %v547_v15 = vmax.f32 %v483_v62, 0.0 }
  0xc3   : > { %796 = vmatprep.subr.mxu0 %v496_v42  ;;  %885 = vmatprep.subr.mxu1 %v498_v43  ;;  %v2697_v8 = vrot.slane %v2518_v37, %v297_v16  ;;  %v469_v10 = vadd.f32 %v2540_v52, %v389_v55  ;;  %v374_v11 = vmul.f32 %v2553_v57, %v2528_v41  ;;  %v549_v27 = vmax.f32 %v485_v63, 0.0 }
  0xc4   : > { %664 = vmatprep.mubr.f32.mxu0 %v2354_v6  ;;  %753 = vmatprep.mubr.f32.mxu1 %v2354_v6  ;;  %v371_v14 = vmul.f32 %v2637_v35, %v2528_v41  ;;  %v532_v28 = vmax.f32 %v468_v0, 0.0  ;;  %v534_v29 = vmax.f32 %v470_v2, 0.0  ;;  %v373_v16 = vmul.f32 %v2642_v31, %v2528_v41 }
  0xc5   : > { %797 = vmatpush1.msra.mxu0 %v495_v46  ;;  %886 = vmatpush1.msra.mxu1 %v497_v47  ;;  %v452_v18 = vadd.f32 %v2572_v17, %v372_v5  ;;  %v454_v30 = vadd.f32 %v2572_v17, %v374_v11  ;;  %v356_v25 = vmul.f32 %v2534_v48, %v2542_v53  ;;  %v531_v19 = vmax.f32 %v467_v1, 0.0 }
  0xc6   : > { %2149 = vmatmul.mubr.msk.f32.gmra.mxu0 %vm575_vm0, %v2654_v49  ;;  %2153 = vmatmul.mubr.msk.f32.gmra.mxu1 %vm575_vm0, %v2654_v49  ;;  %v451_v24 = vadd.f32 %v2572_v17, %v371_v14  ;;  %v453_v33 = vadd.f32 %v2572_v17, %v373_v16  ;;  %v358_v34 = vmul.f32 %v2553_v57, %v2542_v53  ;;  %v533_v38 = vmax.f32 %v469_v10, 0.0 }
  0xc7   : > { %968 = vmatprep.subr.mxu0 %v548_v56  ;;  %1057 = vmatprep.subr.mxu1 %v550_v58  ;;  %v355_v40 = vmul.f32 %v2637_v35, %v2542_v53  ;;  %v357_v48 = vmul.f32 %v2642_v31, %v2542_v53  ;;  %v408_v20 = vmul.f32 %v2685_v4, %v2492_v23  ;;  %v516_v35 = vmax.f32 %v452_v18, 0.0 }
  0xc8   : > { %670 = vmatprep.mubr.f32.mxu0 %v2354_v6  ;;  %759 = vmatprep.mubr.f32.mxu1 %v2354_v6  ;;  %v410_v39 = vmul.f32 %v2697_v8, %v2492_v23  ;;  %v436_v12 = vadd.f32 %v2565_v7, %v356_v25  ;;  %v438_v57 = vadd.f32 %v2565_v7, %v358_v34  ;;  %v518_v13 = vmax.f32 %v454_v30, 0.0 }
  0xc9   : > { %v435_v42 = vadd.f32 %v2565_v7, %v355_v40  ;;  %v437_v31 = vadd.f32 %v2565_v7, %v357_v48  ;;  %v515_v43 = vmax.f32 %v451_v24, 0.0  ;;  %v517_v44 = vmax.f32 %v453_v33, 0.0 }
  0xca   : > { %2150 = vmatmul.mubr.msk.f32.gmra.mxu0 %vm575_vm0, %v2670_v61  ;;  %2154 = vmatmul.mubr.msk.f32.gmra.mxu1 %vm575_vm0, %v2670_v61  ;;  %v488_v45 = vadd.f32 %v2490_v22, %v408_v20  ;;  %v490_v46 = vadd.f32 %v2490_v22, %v410_v39  ;;  %v500_v47 = vmax.f32 %v436_v12, 0.0  ;;  %v502_v50 = vmax.f32 %v438_v57, 0.0 }
  0xcb   : > { %830 = vmatprep.mubr.f32.mxu0 %v2354_v6  ;;  %919 = vmatprep.mubr.f32.mxu1 %v2354_v6  ;;  %v318_v51 = vrot.slane %v2518_v37, %v285_v21  ;;  %v326_v56 = vrot.slane %v2518_v37, %v293_v26  ;;  %v499_v58 = vmax.f32 %v435_v42, 0.0  ;;  %v501_v59 = vmax.f32 %v437_v31, 0.0 }
  0xcc   : > { %v552_v60 = vmax.f32 %v488_v45, 0.0  ;;  %v554_v62 = vmax.f32 %v490_v46, 0.0  ;;  %v392_v26 = vmul.f32 %v2685_v4, %v2516_v36  ;;  %v394_v37 = vmul.f32 %v2697_v8, %v2516_v36 }
  0xcd   : > { %v407_v21 = vmul.f32 %v318_v51, %v2492_v23  ;;  %v409_v63 = vmul.f32 %v326_v56, %v2492_v23  ;;  %v391_v3 = vmul.f32 %v318_v51, %v2516_v36  ;;  %v393_v1 = vmul.f32 %v326_v56, %v2516_v36 }
  0xce   : > { %2155 = vmatmul.mubr.msk.f32.vlgmr.msra.gmra.mxu0 %vm575_vm0, %v2595_v54  ;;  %2159 = vmatmul.mubr.msk.f32.vlgmr.msra.gmra.mxu1 %vm575_vm0, %v2595_v54  ;;  %v472_v2 = vadd.f32 %v2540_v52, %v392_v26  ;;  %v474_v55 = vadd.f32 %v2540_v52, %v394_v37  ;;  %v378_v36 = vmul.f32 %v2697_v8, %v2528_v41 }
  0xcf   : > { %969 = vmatpush1.msra.mxu0 %v547_v15  ;;  %1058 = vmatpush1.msra.mxu1 %v549_v27  ;;  %v487_v23 = vadd.f32 %v2490_v22, %v407_v21  ;;  %v489_v0 = vadd.f32 %v2490_v22, %v409_v63  ;;  %v471_v5 = vadd.f32 %v2540_v52, %v391_v3 }
  0xd0   : > { %970 = vmatprep.subr.mxu0 %v532_v28  ;;  %1059 = vmatprep.subr.mxu1 %v534_v29  ;;  %v473_v22 = vadd.f32 %v2540_v52, %v393_v1  ;;  %v376_v15 = vmul.f32 %v2685_v4, %v2528_v41  ;;  %v536_v14 = vmax.f32 %v472_v2, 0.0  ;;  %v375_v27 = vmul.f32 %v318_v51, %v2528_v41 }
  0xd1   : > { %971 = vmatpush1.msra.mxu0 %v531_v19  ;;  %1060 = vmatpush1.msra.mxu1 %v533_v38  ;;  %v551_v10 = vmax.f32 %v487_v23, 0.0  ;;  %v553_v11 = vmax.f32 %v489_v0, 0.0  ;;  %v538_v28 = vmax.f32 %v474_v55, 0.0  ;;  %v458_v16 = vadd.f32 %v2572_v17, %v378_v36 }
  0xd2   : > { %836 = vmatprep.mubr.f32.mxu0 %v2354_v6  ;;  %925 = vmatprep.mubr.f32.mxu1 %v2354_v6  ;;  %v456_v29 = vadd.f32 %v2572_v17, %v376_v15  ;;  %v377_v18 = vmul.f32 %v326_v56, %v2528_v41  ;;  %v535_v52 = vmax.f32 %v471_v5, 0.0  ;;  %v455_v30 = vadd.f32 %v2572_v17, %v375_v27 }
  0xd3   : > { %972 = vmatprep.subr.mxu0 %v516_v35  ;;  %1061 = vmatprep.subr.mxu1 %v518_v13  ;;  %v360_v24 = vmul.f32 %v2685_v4, %v2542_v53  ;;  %v362_v25 = vmul.f32 %v2697_v8, %v2542_v53  ;;  %v537_v19 = vmax.f32 %v473_v22, 0.0  ;;  %v359_v33 = vmul.f32 %v318_v51, %v2542_v53 }
  0xd4   : > { %2156 = vmatmul.mubr.msk.f32.gmra.mxu0 %vm575_vm0, %v2626_v32  ;;  %2160 = vmatmul.mubr.msk.f32.gmra.mxu1 %vm575_vm0, %v2626_v32  ;;  %v457_v41 = vadd.f32 %v2572_v17, %v377_v18  ;;  %v361_v34 = vmul.f32 %v326_v56, %v2542_v53  ;;  %v520_v4 = vmax.f32 %v456_v29, 0.0  ;;  %v522_v48 = vmax.f32 %v458_v16, 0.0 }
  0xd5   : > { %973 = vmatpush1.msra.mxu0 %v515_v43  ;;  %1062 = vmatpush1.msra.mxu1 %v517_v44  ;;  %v440_v40 = vadd.f32 %v2565_v7, %v360_v24  ;;  %v442_v38 = vadd.f32 %v2565_v7, %v362_v25  ;;  %v439_v8 = vadd.f32 %v2565_v7, %v359_v33  ;;  %v519_v53 = vmax.f32 %v455_v30, 0.0  ;;  %v2842_v44 = vpop.permute.xlu1 %572 }
  0xd6   : > { %974 = vmatprep.subr.mxu0 %v500_v47  ;;  %1063 = vmatprep.subr.mxu1 %v502_v50  ;;  %v441_v20 = vadd.f32 %v2565_v7, %v361_v34  ;;  %v521_v17 = vmax.f32 %v457_v41, 0.0 }
  0xd7   : > { %975 = vmatpush1.msra.mxu0 %v499_v58  ;;  %1064 = vmatpush1.msra.mxu1 %v501_v59  ;;  %v504_v39 = vmax.f32 %v440_v40, 0.0  ;;  %v506_v12 = vmax.f32 %v442_v38, 0.0  ;;  %v503_v57 = vmax.f32 %v439_v8, 0.0  ;;  %v2846_v58 = vpop.permute.xlu0 %568 }
  0xd8   : > { %842 = vmatprep.mubr.f32.mxu0 %v2354_v6  ;;  %931 = vmatprep.mubr.f32.mxu1 %v2354_v6  ;;  %v505_v7 = vmax.f32 %v441_v20, 0.0 }
  0xd9   : > { %1146 = vmatprep.subr.mxu0 %v552_v60  ;;  %1235 = vmatprep.subr.mxu1 %v554_v62  ;;  %v2844_v51 = vpop.permute.xlu1 %564 }
  0xda   : > { %2157 = vmatmul.mubr.msk.f32.gmra.mxu0 %vm575_vm0, %v2654_v49  ;;  %2161 = vmatmul.mubr.msk.f32.gmra.mxu1 %vm575_vm0, %v2654_v49 }
  0xdb   : > { %848 = vmatprep.mubr.f32.mxu0 %v2354_v6  ;;  %937 = vmatprep.mubr.f32.mxu1 %v2354_v6 }
  0xdd   : > { %v2860_v1 = vpop.permute.xlu1 %560 }
  0xde   : > { %2158 = vmatmul.mubr.msk.f32.gmra.mxu0 %vm575_vm0, %v2670_v61  ;;  %2162 = vmatmul.mubr.msk.f32.gmra.mxu1 %vm575_vm0, %v2670_v61 }
  0xdf   : > { %1008 = vmatprep.mubr.f32.mxu0 %v2354_v6  ;;  %1097 = vmatprep.mubr.f32.mxu1 %v2354_v6 }
  0xe2   : > { %2163 = vmatmul.mubr.msk.f32.vlgmr.msra.gmra.mxu0 %vm575_vm0, %v2595_v54  ;;  %2167 = vmatmul.mubr.msk.f32.vlgmr.msra.gmra.mxu1 %vm575_vm0, %v2595_v54 }
  0xe3   : > { %1147 = vmatpush1.msra.mxu0 %v551_v10  ;;  %1236 = vmatpush1.msra.mxu1 %v553_v11 }
  0xe4   : > { %1148 = vmatprep.subr.mxu0 %v536_v14  ;;  %1237 = vmatprep.subr.mxu1 %v538_v28 }
  0xe5   : > { %1149 = vmatpush1.msra.mxu0 %v535_v52  ;;  %1238 = vmatpush1.msra.mxu1 %v537_v19 }
  0xe6   : > { %1014 = vmatprep.mubr.f32.mxu0 %v2354_v6  ;;  %1103 = vmatprep.mubr.f32.mxu1 %v2354_v6 }
  0xe7   : > { %1150 = vmatprep.subr.mxu0 %v520_v4  ;;  %1239 = vmatprep.subr.mxu1 %v522_v48 }
  0xe8   : > { %2164 = vmatmul.mubr.msk.f32.gmra.mxu0 %vm575_vm0, %v2626_v32  ;;  %2168 = vmatmul.mubr.msk.f32.gmra.mxu1 %vm575_vm0, %v2626_v32 }
  0xe9   : > { %1151 = vmatpush1.msra.mxu0 %v519_v53  ;;  %1240 = vmatpush1.msra.mxu1 %v521_v17 }
  0xea   : > { %1152 = vmatprep.subr.mxu0 %v504_v39  ;;  %1241 = vmatprep.subr.mxu1 %v506_v12 }
  0xeb   : > { %1153 = vmatpush1.msra.mxu0 %v503_v57  ;;  %1242 = vmatpush1.msra.mxu1 %v505_v7  ;;  %v2877_v57 = vld [vmem:[%s3024_s3] sm:$0x1] }
  0xec   : > { %1020 = vmatprep.mubr.f32.mxu0 %v2354_v6  ;;  %1109 = vmatprep.mubr.f32.mxu1 %v2354_v6 }
  0xed   : > { %2165 = vmatmul.mubr.msk.f32.gmra.mxu0 %vm575_vm0, %v2654_v49  ;;  %2169 = vmatmul.mubr.msk.f32.gmra.mxu1 %vm575_vm0, %v2654_v49 }
  0xee   : > { %1026 = vmatprep.mubr.f32.mxu0 %v2354_v6  ;;  %1115 = vmatprep.mubr.f32.mxu1 %v2354_v6 }
  0xf1   : > { %2166 = vmatmul.mubr.msk.f32.gmra.mxu0 %vm575_vm0, %v2670_v61  ;;  %2170 = vmatmul.mubr.msk.f32.gmra.mxu1 %vm575_vm0, %v2670_v61 }
  0xf2   : > { %1186 = vmatprep.mubr.f32.mxu0 %v2354_v6  ;;  %1275 = vmatprep.mubr.f32.mxu1 %v2354_v6 }
  0xf5   : > { %2171 = vmatmul.mubr.msk.f32.vlgmr.msra.gmra.mxu0 %vm575_vm0, %v2595_v54  ;;  %2175 = vmatmul.mubr.msk.f32.vlgmr.msra.gmra.mxu1 %vm575_vm0, %v2595_v54 }
  0xf6   : > { %1192 = vmatprep.mubr.f32.mxu0 %v2354_v6  ;;  %1281 = vmatprep.mubr.f32.mxu1 %v2354_v6 }
  0xf9   : > { %2172 = vmatmul.mubr.msk.f32.gmra.mxu0 %vm575_vm0, %v2626_v32  ;;  %2176 = vmatmul.mubr.msk.f32.gmra.mxu1 %vm575_vm0, %v2626_v32 }
  0xfa   : > { %1198 = vmatprep.mubr.f32.mxu0 %v2354_v6  ;;  %1287 = vmatprep.mubr.f32.mxu1 %v2354_v6 }
  0xfd   : > { %2173 = vmatmul.mubr.msk.f32.gmra.mxu0 %vm575_vm0, %v2654_v49  ;;  %2177 = vmatmul.mubr.msk.f32.gmra.mxu1 %vm575_vm0, %v2654_v49 }
  0xfe   : > { %1204 = vmatprep.mubr.f32.mxu0 %v2354_v6  ;;  %1293 = vmatprep.mubr.f32.mxu1 %v2354_v6 }
 0x101   : > { %2174 = vmatmul.mubr.msk.f32.gmra.mxu0 %vm575_vm0, %v2670_v61  ;;  %2178 = vmatmul.mubr.msk.f32.gmra.mxu1 %vm575_vm0, %v2670_v61 }
 0x102   : > { %1434 = vmatprep.mubr.f32.mxu0 %v2354_v6  ;;  %1505 = vmatprep.mubr.f32.mxu1 %v2354_v6 }
 0x17a   : > { %v654_v54 = vpop.f32.mrf.mxu0  ;;  %v743_v32 = vpop.f32.mrf.mxu1 }
 0x17b   : > { %v655_v19 = vadd.f32 %v654_v54, %v2860_v1  ;;  %v744_v41 = vadd.f32 %v743_v32, %v2860_v1 }
 0x17c   : > { %v656_v35 = vpop.f32.mrf.mxu0  ;;  %v745_v13 = vpop.f32.mrf.mxu1 }
 0x17d   : > { %v657_v16 = vadd.f32 %v656_v35, %v2860_v1  ;;  %v746_v18 = vadd.f32 %v745_v13, %v2860_v1  ;;  %v1300_v39 = vmax.f32 %v655_v19, 0.0  ;;  %v1302_v12 = vmax.f32 %v744_v41, 0.0 }
 0x17f   : > { %v1301_v8 = vmax.f32 %v657_v16, 0.0  ;;  %v1303_v20 = vmax.f32 %v746_v18, 0.0 }
 0x180   : > { %v660_v42 = vpop.f32.mrf.mxu0  ;;  %v749_v49 = vpop.f32.mrf.mxu1 }
 0x181   : > { %v661_v10 = vadd.f32 %v660_v42, %v2844_v51  ;;  %v750_v11 = vadd.f32 %v749_v49, %v2844_v51 }
 0x182   : > { %v662_v31 = vpop.f32.mrf.mxu0  ;;  %v751_v43 = vpop.f32.mrf.mxu1 }
 0x183   : > { %v663_v5 = vadd.f32 %v662_v31, %v2844_v51  ;;  %v752_v22 = vadd.f32 %v751_v43, %v2844_v51  ;;  %v1316_v40 = vmax.f32 %v661_v10, 0.0  ;;  %v1318_v38 = vmax.f32 %v750_v11, 0.0 }
 0x185   : > { %v1317_v33 = vmax.f32 %v663_v5, 0.0  ;;  %v1319_v34 = vmax.f32 %v752_v22, 0.0 }
 0x186   : > { %v666_v45 = vpop.f32.mrf.mxu0  ;;  %v755_v46 = vpop.f32.mrf.mxu1 }
 0x187   : > { %v667_v3 = vadd.f32 %v666_v45, %v2846_v58  ;;  %v756_v55 = vadd.f32 %v755_v46, %v2846_v58 }
 0x188   : > { %v668_v47 = vpop.f32.mrf.mxu0  ;;  %v757_v50 = vpop.f32.mrf.mxu1 }
 0x189   : > { %v669_v63 = vadd.f32 %v668_v47, %v2846_v58  ;;  %v758_v26 = vadd.f32 %v757_v50, %v2846_v58  ;;  %v1332_v24 = vmax.f32 %v667_v3, 0.0  ;;  %v1334_v25 = vmax.f32 %v756_v55, 0.0 }
 0x18a   : > { %v672_v61 = vpop.f32.mrf.mxu0  ;;  %v761_v56 = vpop.f32.mrf.mxu1 }
 0x18b   : > { %v673_v59 = vadd.f32 %v672_v61, %v2842_v44  ;;  %v762_v60 = vadd.f32 %v761_v56, %v2842_v44  ;;  %v1333_v52 = vmax.f32 %v669_v63, 0.0  ;;  %v1335_v30 = vmax.f32 %v758_v26, 0.0 }
 0x18c   : > { %v674_v62 = vpop.f32.mrf.mxu0  ;;  %v763_v21 = vpop.f32.mrf.mxu1 }
 0x18d   : > { %v675_v37 = vadd.f32 %v674_v62, %v2842_v44  ;;  %v764_v23 = vadd.f32 %v763_v21, %v2842_v44  ;;  %v1348_v14 = vmax.f32 %v673_v59, 0.0  ;;  %v1350_v27 = vmax.f32 %v762_v60, 0.0 }
 0x18e   : > { %v2854_v0 = vpop.f32.mrf.mxu0  ;;  %v2856_v2 = vpop.f32.mrf.mxu1 }
 0x18f   : > { %v1349_v15 = vmax.f32 %v675_v37, 0.0  ;;  %v1351_v36 = vmax.f32 %v764_v23, 0.0  ;;  %v922_v16 = vadd.f32 %v2856_v2, %v2860_v1 }
 0x190   : > { %v2866_v28 = vpop.f32.mrf.mxu0  ;;  %v2868_v29 = vpop.f32.mrf.mxu1 }
 0x191   : > { %1394 = vmatprep.subr.mxu0 %v1349_v15  ;;  %1465 = vmatprep.subr.mxu1 %v1351_v36  ;;  %v835_v36 = vadd.f32 %v2866_v28, %v2860_v1  ;;  %v924_v10 = vadd.f32 %v2868_v29, %v2860_v1  ;;  %v1306_v2 = vmax.f32 %v922_v16, 0.0 }
 0x192   : > { %1395 = vmatpush1.msra.mxu0 %v1348_v14  ;;  %1466 = vmatpush1.msra.mxu1 %v1350_v27  ;;  %v833_v27 = vadd.f32 %v2854_v0, %v2860_v1 }
 0x193   : > { %1396 = vmatprep.subr.mxu0 %v1333_v52  ;;  %1467 = vmatprep.subr.mxu1 %v1335_v30  ;;  %v1305_v41 = vmax.f32 %v835_v36, 0.0 }
 0x194   : > { %v838_v4 = vpop.f32.mrf.mxu0  ;;  %v927_v48 = vpop.f32.mrf.mxu1  ;;  %1397 = vmatpush1.msra.mxu0 %v1332_v24  ;;  %1468 = vmatpush1.msra.mxu1 %v1334_v25  ;;  %v1304_v0 = vmax.f32 %v833_v27, 0.0 }
 0x195   : > { %1398 = vmatprep.subr.mxu0 %v1317_v33  ;;  %1469 = vmatprep.subr.mxu1 %v1319_v34  ;;  %v839_v23 = vadd.f32 %v838_v4, %v2844_v51  ;;  %v928_v3 = vadd.f32 %v927_v48, %v2844_v51  ;;  %v1307_v33 = vmax.f32 %v924_v10, 0.0 }
 0x196   : > { %v840_v53 = vpop.f32.mrf.mxu0  ;;  %v929_v17 = vpop.f32.mrf.mxu1  ;;  %1399 = vmatpush1.msra.mxu0 %v1316_v40  ;;  %1470 = vmatpush1.msra.mxu1 %v1318_v38 }
 0x197   : > { %1400 = vmatprep.subr.mxu0 %v1301_v8  ;;  %1471 = vmatprep.subr.mxu1 %v1303_v20  ;;  %v841_v21 = vadd.f32 %v840_v53, %v2844_v51  ;;  %v930_v63 = vadd.f32 %v929_v17, %v2844_v51  ;;  %v1320_v28 = vmax.f32 %v839_v23, 0.0  ;;  %v1322_v29 = vmax.f32 %v928_v3, 0.0 }
 0x198   : > { %1401 = vmatpush1.msra.mxu0 %v1300_v39  ;;  %1472 = vmatpush1.msra.mxu1 %v1302_v12 }
 0x199   : > { %2179 = vmatmul.mubr.msk.f32.vlgmr.msra.gmra.mxu0 %vm575_vm0, %v2877_v57  ;;  %2180 = vmatmul.mubr.msk.f32.vlgmr.msra.gmra.mxu1 %vm575_vm0, %v2877_v57  ;;  %v1321_v30 = vmax.f32 %v841_v21, 0.0  ;;  %v1323_v24 = vmax.f32 %v930_v63, 0.0 }
 0x19a   : > { %v844_v7 = vpop.f32.mrf.mxu0  ;;  %v933_v54 = vpop.f32.mrf.mxu1  ;;  %1576 = vmatprep.mubr.f32.mxu0 %v2354_v6  ;;  %1647 = vmatprep.mubr.f32.mxu1 %v2354_v6 }
 0x19b   : > { %v845_v56 = vadd.f32 %v844_v7, %v2846_v58  ;;  %v934_v59 = vadd.f32 %v933_v54, %v2846_v58 }
 0x19c   : > { %v846_v32 = vpop.f32.mrf.mxu0  ;;  %v935_v35 = vpop.f32.mrf.mxu1 }
 0x19d   : > { %v847_v46 = vadd.f32 %v846_v32, %v2846_v58  ;;  %v936_v47 = vadd.f32 %v935_v35, %v2846_v58  ;;  %v1336_v18 = vmax.f32 %v845_v56, 0.0  ;;  %v1338_v52 = vmax.f32 %v934_v59, 0.0 }
 0x19e   : > { %v850_v13 = vpop.f32.mrf.mxu0  ;;  %v939_v42 = vpop.f32.mrf.mxu1 }
 0x19f   : > { %v851_v49 = vadd.f32 %v850_v13, %v2842_v44  ;;  %v940_v31 = vadd.f32 %v939_v42, %v2842_v44  ;;  %v1337_v11 = vmax.f32 %v847_v46, 0.0  ;;  %v1339_v14 = vmax.f32 %v936_v47, 0.0 }
 0x1a0   : > { %v852_v43 = vpop.f32.mrf.mxu0  ;;  %v941_v45 = vpop.f32.mrf.mxu1 }
 0x1a1   : > { %v853_v50 = vadd.f32 %v852_v43, %v2842_v44  ;;  %v942_v61 = vadd.f32 %v941_v45, %v2842_v44  ;;  %v1352_v55 = vmax.f32 %v851_v49, 0.0  ;;  %v1354_v5 = vmax.f32 %v940_v31, 0.0 }
 0x1a2   : > { %v2893_v60 = vpop.f32.mrf.mxu0  ;;  %v2895_v62 = vpop.f32.mrf.mxu1 }
 0x1a3   : > { %v1353_v26 = vmax.f32 %v853_v50, 0.0  ;;  %v1355_v37 = vmax.f32 %v942_v61, 0.0  ;;  %v1100_v36 = vadd.f32 %v2895_v62, %v2860_v1 }
 0x1a4   : > { %v2901_v22 = vpop.f32.mrf.mxu0  ;;  %v2903_v15 = vpop.f32.mrf.mxu1 }
 0x1a5   : > { %1536 = vmatprep.subr.mxu0 %v1353_v26  ;;  %1607 = vmatprep.subr.mxu1 %v1355_v37  ;;  %v1013_v37 = vadd.f32 %v2901_v22, %v2860_v1  ;;  %v1102_v23 = vadd.f32 %v2903_v15, %v2860_v1 }
 0x1a6   : > { %1537 = vmatpush1.msra.mxu0 %v1352_v55  ;;  %1608 = vmatpush1.msra.mxu1 %v1354_v5  ;;  %v1011_v5 = vadd.f32 %v2893_v60, %v2860_v1 }
 0x1a7   : > { %1538 = vmatprep.subr.mxu0 %v1337_v11  ;;  %1609 = vmatprep.subr.mxu1 %v1339_v14  ;;  %v1309_v60 = vmax.f32 %v1013_v37, 0.0  ;;  %v2356_v37 = vmov 1966171168  }
 0x1a8   : > { %v1016_v25 = vpop.f32.mrf.mxu0  ;;  %v1105_v19 = vpop.f32.mrf.mxu1  ;;  %1539 = vmatpush1.msra.mxu0 %v1336_v18  ;;  %1610 = vmatpush1.msra.mxu1 %v1338_v52  ;;  %v1308_v62 = vmax.f32 %v1011_v5, 0.0 }
 0x1a9   : > { %1540 = vmatprep.subr.mxu0 %v1321_v30  ;;  %1611 = vmatprep.subr.mxu1 %v1323_v24  ;;  %v1017_v61 = vadd.f32 %v1016_v25, %v2844_v51  ;;  %v1106_v56 = vadd.f32 %v1105_v19, %v2844_v51  ;;  %v1311_v24 = vmax.f32 %v1102_v23, 0.0  ;;  %v1959_v23 = vunpack.c.l.s4 %v2356_v37 }
 0x1aa   : > { %v1018_v34 = vpop.f32.mrf.mxu0  ;;  %v1107_v40 = vpop.f32.mrf.mxu1  ;;  %1541 = vmatpush1.msra.mxu0 %v1320_v28  ;;  %1612 = vmatpush1.msra.mxu1 %v1322_v29  ;;  %v1310_v28 = vmax.f32 %v1100_v36, 0.0 }
 0x1ab   : > { %1542 = vmatprep.subr.mxu0 %v1305_v41  ;;  %1613 = vmatprep.subr.mxu1 %v1307_v33  ;;  %v1019_v45 = vadd.f32 %v1018_v34, %v2844_v51  ;;  %v1108_v46 = vadd.f32 %v1107_v40, %v2844_v51  ;;  %v1324_v15 = vmax.f32 %v1017_v61, 0.0  ;;  %v1326_v18 = vmax.f32 %v1106_v56, 0.0 }
 0x1ac   : > { %1543 = vmatpush1.msra.mxu0 %v1304_v0  ;;  %1614 = vmatpush1.msra.mxu1 %v1306_v2  ;;  %v1960_v5 = vunpack.c.0.s8 %v1959_v23 }
 0x1ad   : > { %v1022_v38 = vpop.f32.mrf.mxu0  ;;  %v1111_v4 = vpop.f32.mrf.mxu1  ;;  %2181 = vmatmul.mubr.msk.f32.vlgmr.msra.gmra.mxu0 %vm575_vm0, %v2877_v57  ;;  %2182 = vmatmul.mubr.msk.f32.vlgmr.msra.gmra.mxu1 %vm575_vm0, %v2877_v57  ;;  %v1325_v22 = vmax.f32 %v1019_v45, 0.0  ;;  %v1327_v16 = vmax.f32 %v1108_v46, 0.0 }
 0x1ae   : > { %1718 = vmatprep.mubr.f32.mxu0 %v2354_v6  ;;  %1789 = vmatprep.mubr.f32.mxu1 %v2354_v6  ;;  %v1023_v42 = vadd.f32 %v1022_v38, %v2846_v58  ;;  %v1112_v49 = vadd.f32 %v1111_v4, %v2846_v58 }
 0x1af   : > { %v1024_v48 = vpop.f32.mrf.mxu0  ;;  %v1113_v8 = vpop.f32.mrf.mxu1 }
 0x1b0   : > { %v1025_v54 = vadd.f32 %v1024_v48, %v2846_v58  ;;  %v1114_v32 = vadd.f32 %v1113_v8, %v2846_v58  ;;  %v1340_v10 = vmax.f32 %v1023_v42, 0.0  ;;  %v1342_v11 = vmax.f32 %v1112_v49, 0.0 }
 0x1b1   : > { %v1028_v20 = vpop.f32.mrf.mxu0  ;;  %v1117_v53 = vpop.f32.mrf.mxu1 }
 0x1b2   : > { %v1029_v17 = vadd.f32 %v1028_v20, %v2842_v44  ;;  %v1118_v39 = vadd.f32 %v1117_v53, %v2842_v44  ;;  %v1341_v3 = vmax.f32 %v1025_v54, 0.0  ;;  %v1343_v55 = vmax.f32 %v1114_v32, 0.0 }
 0x1b3   : > { %v1030_v12 = vpop.f32.mrf.mxu0  ;;  %v1119_v7 = vpop.f32.mrf.mxu1 }
 0x1b4   : > { %v1031_v35 = vadd.f32 %v1030_v12, %v2842_v44  ;;  %v1120_v13 = vadd.f32 %v1119_v7, %v2842_v44  ;;  %v1356_v59 = vmax.f32 %v1029_v17, 0.0  ;;  %v1358_v21 = vmax.f32 %v1118_v39, 0.0 }
 0x1b5   : > { %v2927_v31 = vpop.f32.mrf.mxu0  ;;  %v2929_v43 = vpop.f32.mrf.mxu1 }
 0x1b6   : > { %v1357_v47 = vmax.f32 %v1031_v35, 0.0  ;;  %v1359_v50 = vmax.f32 %v1120_v13, 0.0  ;;  %v1189_v45 = vadd.f32 %v2927_v31, %v2860_v1  ;;  %v1278_v46 = vadd.f32 %v2929_v43, %v2860_v1 }
 0x1b7   : > { %v2935_v63 = vpop.f32.mrf.mxu0  ;;  %v2937_v26 = vpop.f32.mrf.mxu1 }
 0x1b8   : > { %1678 = vmatprep.subr.mxu0 %v1357_v47  ;;  %1749 = vmatprep.subr.mxu1 %v1359_v50  ;;  %v1191_v42 = vadd.f32 %v2935_v63, %v2860_v1  ;;  %v1312_v31 = vmax.f32 %v1189_v45, 0.0 }
 0x1b9   : > { %v1194_v14 = vpop.f32.mrf.mxu0  ;;  %v1283_v27 = vpop.f32.mrf.mxu1  ;;  %1679 = vmatpush1.msra.mxu0 %v1356_v59  ;;  %1750 = vmatpush1.msra.mxu1 %v1358_v21 }
 0x1ba   : > { %1680 = vmatprep.subr.mxu0 %v1341_v3  ;;  %1751 = vmatprep.subr.mxu1 %v1343_v55  ;;  %v1195_v54 = vadd.f32 %v1194_v14, %v2844_v51  ;;  %v1284_v32 = vadd.f32 %v1283_v27, %v2844_v51  ;;  %v1313_v21 = vmax.f32 %v1191_v42, 0.0  ;;  %v1366_v3 = vstv %s1365_s11 }
 0x1bb   : > { %v1196_v52 = vpop.f32.mrf.mxu0  ;;  %v1285_v30 = vpop.f32.mrf.mxu1  ;;  %1681 = vmatpush1.msra.mxu0 %v1340_v10  ;;  %1752 = vmatpush1.msra.mxu1 %v1342_v11 }
 0x1bc   : > { %1682 = vmatprep.subr.mxu0 %v1325_v22  ;;  %1753 = vmatprep.subr.mxu1 %v1327_v16  ;;  %v1286_v39 = vadd.f32 %v1285_v30, %v2844_v51  ;;  %v1328_v56 = vmax.f32 %v1195_v54, 0.0  ;;  %v1330_v59 = vmax.f32 %v1284_v32, 0.0  ;;  %v1963_v16 = vsub.s32 %v1960_v5, %v2472_v9 }
 0x1bd   : > { %v1200_v29 = vpop.f32.mrf.mxu0  ;;  %v1289_v25 = vpop.f32.mrf.mxu1  ;;  %1683 = vmatpush1.msra.mxu0 %v1324_v15  ;;  %1754 = vmatpush1.msra.mxu1 %v1326_v18 }
 0x1be   : > { %1684 = vmatprep.subr.mxu0 %v1309_v60  ;;  %1755 = vmatprep.subr.mxu1 %v1311_v24  ;;  %v1201_v53 = vadd.f32 %v1200_v29, %v2846_v58  ;;  %v1290_v17 = vadd.f32 %v1289_v25, %v2846_v58  ;;  %v1331_v61 = vmax.f32 %v1286_v39, 0.0 }
 0x1bf   : > { %v1202_v19 = vpop.f32.mrf.mxu0  ;;  %v1291_v41 = vpop.f32.mrf.mxu1  ;;  %1685 = vmatpush1.msra.mxu0 %v1308_v62  ;;  %1756 = vmatpush1.msra.mxu1 %v1310_v28 }
 0x1c0   : > { %2183 = vmatmul.mubr.msk.f32.vlgmr.msra.gmra.mxu0 %vm575_vm0, %v2877_v57  ;;  %2184 = vmatmul.mubr.msk.f32.vlgmr.msra.gmra.mxu1 %vm575_vm0, %v2877_v57  ;;  %v1203_v4 = vadd.f32 %v1202_v19, %v2846_v58  ;;  %v1292_v48 = vadd.f32 %v1291_v41, %v2846_v58  ;;  %v1344_v47 = vmax.f32 %v1201_v53, 0.0 }
 0x1c1   : > { %v1206_v33 = vpop.f32.mrf.mxu0  ;;  %v1295_v0 = vpop.f32.mrf.mxu1  ;;  %1860 = vmatprep.mubr.f32.mxu0 %v2354_v6  ;;  %1931 = vmatprep.mubr.f32.mxu1 %v2354_v6  ;;  %v1197_v6 = vadd.f32 %v1196_v52, %v2844_v51  ;;  %v1346_v51 = vmax.f32 %v1290_v17, 0.0 }
 0x1c2   : > { %v1207_v2 = vadd.f32 %v1206_v33, %v2842_v44  ;;  %v1296_v34 = vadd.f32 %v1295_v0, %v2842_v44  ;;  %v1345_v49 = vmax.f32 %v1203_v4, 0.0  ;;  %v1347_v58 = vmax.f32 %v1292_v48, 0.0 }
 0x1c3   : > { %v1208_v40 = vpop.f32.mrf.mxu0  ;;  %v1297_v38 = vpop.f32.mrf.mxu1  ;;  %v1329_v50 = vmax.f32 %v1197_v6, 0.0 }
 0x1c4   : > { %v1209_v8 = vadd.f32 %v1208_v40, %v2842_v44  ;;  %v1298_v20 = vadd.f32 %v1297_v38, %v2842_v44  ;;  %v1360_v35 = vmax.f32 %v1207_v2, 0.0  ;;  %v1362_v13 = vmax.f32 %v1296_v34, 0.0 }
 0x1c5   : > { %v1280_v44 = vadd.f32 %v2937_v26, %v2860_v1  ;;  %v1314_v26 = vmax.f32 %v1278_v46, 0.0 }
 0x1c6   : > { %v1361_v12 = vmax.f32 %v1209_v8, 0.0  ;;  %v1363_v7 = vmax.f32 %v1298_v20, 0.0 }
 0x1c7   : > { %v1315_v63 = vmax.f32 %v1280_v44, 0.0 }
 0x1c8   : > { %1820 = vmatprep.subr.mxu0 %v1361_v12  ;;  %1891 = vmatprep.subr.mxu1 %v1363_v7 }
 0x1c9   : > { %1821 = vmatpush1.msra.mxu0 %v1360_v35  ;;  %1892 = vmatpush1.msra.mxu1 %v1362_v13 }
 0x1ca   : > { %1822 = vmatprep.subr.mxu0 %v1345_v49  ;;  %1893 = vmatprep.subr.mxu1 %v1347_v58 }
 0x1cb   : > { %1823 = vmatpush1.msra.mxu0 %v1344_v47  ;;  %1894 = vmatpush1.msra.mxu1 %v1346_v51 }
 0x1cc   : > { %1824 = vmatprep.subr.mxu0 %v1329_v50  ;;  %1895 = vmatprep.subr.mxu1 %v1331_v61 }
 0x1cd   : > { %1825 = vmatpush1.msra.mxu0 %v1328_v56  ;;  %1896 = vmatpush1.msra.mxu1 %v1330_v59 }
 0x1ce   : > { %1826 = vmatprep.subr.mxu0 %v1313_v21  ;;  %1897 = vmatprep.subr.mxu1 %v1315_v63 }
 0x1cf   : > { %1827 = vmatpush1.msra.mxu0 %v1312_v31  ;;  %1898 = vmatpush1.msra.mxu1 %v1314_v26 }
 0x1d0   : > { %2185 = vmatmul.mubr.msk.f32.vlgmr.msra.gmra.mxu0 %vm575_vm0, %v2877_v57  ;;  %2186 = vmatmul.mubr.msk.f32.vlgmr.msra.gmra.mxu1 %vm575_vm0, %v2877_v57 }
 0x259   : > { %v1436_v1 = vpop.f32.mrf.mxu0  ;;  %v1507_v43 = vpop.f32.mrf.mxu1 }
 0x25a   : > { %v1437_v10 = vadd.f32 %v1436_v1, %v1366_v3  ;;  %v1508_v11 = vadd.f32 %v1507_v43, %v1366_v3 }
 0x25b   : > { %v1438_v55 = vpop.f32.mrf.mxu0  ;;  %v1509_v36 = vpop.f32.mrf.mxu1 }
 0x25c   : > { %v1439_v14 = vadd.f32 %v1438_v55, %v1366_v3  ;;  %v1510_v27 = vadd.f32 %v1509_v36, %v1366_v3 }
 0x25e   : > { %v1954_v22 = vcombine.low %v1437_v10, %v1439_v14  ;;  %v1955_v15 = vcombine.low %v1508_v11, %v1510_v27 }
 0x260   : > { %v1964_v52 = vrot.slane %v1954_v22, %v1963_v16  ;;  %v1971_v30 = vrot.slane %v1955_v15, %v1963_v16 }
 0x262   : > { %v1986_v19 = vcombine.low %v1964_v52, %v1971_v30 }
 0x264   : > { %v1994_v34 = vrot.slane %v1986_v19, %v1963_v16 }
 0x26d   : > { %v1578_v18 = vpop.f32.mrf.mxu0  ;;  %v1649_v57 = vpop.f32.mrf.mxu1 }
 0x26e   : > { %v1579_v60 = vadd.f32 %v1578_v18, %v1366_v3  ;;  %v1650_v24 = vadd.f32 %v1649_v57, %v1366_v3 }
 0x26f   : > { %v1580_v62 = vpop.f32.mrf.mxu0  ;;  %v1651_v28 = vpop.f32.mrf.mxu1 }
 0x270   : > { %v1581_v29 = vadd.f32 %v1580_v62, %v1366_v3  ;;  %v1652_v25 = vadd.f32 %v1651_v28, %v1366_v3 }
 0x272   : > { %v1956_v41 = vcombine.low %v1579_v60, %v1581_v29  ;;  %v1957_v33 = vcombine.low %v1650_v24, %v1652_v25 }
 0x274   : > { %v1978_v0 = vrot.slane %v1956_v41, %v1963_v16  ;;  %v1985_v2 = vrot.slane %v1957_v33, %v1963_v16 }
 0x276   : > { %v1987_v9 = vcombine.low %v1978_v0, %v1985_v2 }
 0x278   : > { %v2001_v40 = vrot.slane %v1987_v9, %v1963_v16 }
 0x27a   : > { %v2002_v38 = vcombine.low %v1994_v34, %v2001_v40 }
 0x27c   : > { %2054 = vst [vmem:[%s2981_s14] sm:$0xff] %v2002_v38 }
 0x280   : > { %v1720_v4 = vpop.f32.mrf.mxu0  ;;  %v1791_v48 = vpop.f32.mrf.mxu1 }
 0x281   : > { %v1721_v53 = vadd.f32 %v1720_v4, %v1366_v3  ;;  %v1792_v17 = vadd.f32 %v1791_v48, %v1366_v3 }
 0x282   : > { %v1722_v8 = vpop.f32.mrf.mxu0  ;;  %v1793_v20 = vpop.f32.mrf.mxu1 }
 0x283   : > { %v1723_v6 = vadd.f32 %v1722_v8, %v1366_v3  ;;  %v1794_v39 = vadd.f32 %v1793_v20, %v1366_v3 }
 0x285   : > { %v2003_v12 = vcombine.low %v1721_v53, %v1723_v6  ;;  %v2004_v7 = vcombine.low %v1792_v17, %v1794_v39 }
 0x287   : > { %v2013_v35 = vrot.slane %v2003_v12, %v1963_v16  ;;  %v2020_v13 = vrot.slane %v2004_v7, %v1963_v16 }
 0x289   : > { %v2035_v50 = vcombine.low %v2013_v35, %v2020_v13 }
 0x28b   : > { %v2043_v21 = vrot.slane %v2035_v50, %v1963_v16 }
 0x290   : > { %v1862_v54 = vpop.f32.mrf.mxu0  ;;  %v1933_v32 = vpop.f32.mrf.mxu1 }
 0x291   : > { %v1863_v49 = vadd.f32 %v1862_v54, %v1366_v3  ;;  %v1934_v58 = vadd.f32 %v1933_v32, %v1366_v3 }
 0x292   : > { %v1864_v42 = vpop.f32.mrf.mxu0  ;;  %v1935_v44 = vpop.f32.mrf.mxu1 }
 0x293   : > { %v1865_v45 = vadd.f32 %v1864_v42, %v1366_v3  ;;  %v1936_v46 = vadd.f32 %v1935_v44, %v1366_v3 }
 0x295   : > { %v2005_v47 = vcombine.low %v1863_v49, %v1865_v45  ;;  %v2006_v51 = vcombine.low %v1934_v58, %v1936_v46 }
 0x297   : > { %v2027_v61 = vrot.slane %v2005_v47, %v1963_v16  ;;  %v2034_v56 = vrot.slane %v2006_v51, %v1963_v16 }
 0x299   : > { %v2036_v59 = vcombine.low %v2027_v61, %v2034_v56 }
 0x29b   : > { %v2050_v63 = vrot.slane %v2036_v59, %v1963_v16 }
 0x29d   : > { %v2051_v31 = vcombine.low %v2043_v21, %v2050_v63 }
 0x29f   : > { %2055 = vst [vmem:[%s2981_s14 + $0x8] sm:$0xff] %v2051_v31 }
 0x2a0   : > { %2296 = shalt.err (!%p2293_p0)
}
 0x2a1   : > { %s2297_s7 = scalar_lea.hbm %s2069_s19, 256  ;;  %s2301_s10 = scalar_lea.hbm %s3026_s5, 512 }
 0x2a2   : > { %p2298_p1 = scmp.ne.s32.totalorder %s2069_s19, %s2297_s7  ;;  %p2302_p4 = scmp.lt.s32.totalorder %s2069_s19, %s3026_s5 }
 0x2a3   : > { %p2303_p7 = scmp.lt.s32.totalorder %s2301_s10, %s2297_s7 }
 0x2a4   : > { %p2299_p2 = pnand %p2298_p1, %p2429_p5 }
 0x2a5   : > { %p2304_p6 = por %p2303_p7, %p2302_p4 }
 0x2a6   : > { %p2300_p3 = pneg %p2299_p2 }
 0x2a8   : > { %p2305_p8 = pnand %p2304_p6, %p2300_p3 }
 0x2aa   : > { %2308 = shalt.err (!%p2305_p8)
}
 0x2ab   : > { %2197 = dma.vmem_to_hbm [thread:$0]  (%p2429_p5), %s2072_s16, 256, %s2069_s19, %s2057_s24  }
 0x2ac PF: > { %p2209_p9 = scmp.ge.s32.totalorder %s2347_s23, 2  ;;  %s2083_s13 = sand.u32 1, %s2335_s20  }
 0x2ad   : > { %p3030_p10 = scmp.ne.s32.totalorder %s3028_s30, 0  ;;  %s2084_s14 = scalar_lea.sflag [#allocation5], %s2083_s13 }
 0x2af   : > { %p2204_p11 = pnand %p2209_p9, %p3030_p10 }
 0x2b1   : > { %p2205_p12 = pneg %p2204_p11 }
 0x2b3   : > { %2330 = dma.done.wait (%p2205_p12), %s2084_s14, 256  }
 0x2b4   : > { %2332 = vsyncadd (%p2205_p12), %s2084_s14, 4294967040  ;;  %p17_p13 = scmp.ge.s32.totalorder %s2416_s25, 4   ;;  %s3031_s20 = smov %s2339_s21 }
 0x2b5   : > { %s3032_s21 = smov %s2343_s22  ;;  %s3033_s22 = smov %s2427_s28 }
 0x2b6   : > { %s3034_s23 = smov %s2416_s25  ;;  %19 = sbr.rel (!%p17_p13) target bundleno = 6 (0x6), region = 80 }
 0x2bb   :  { %2089 = vsyncpa [#allocation4], 1 }
 0x2bc   :  { %2091 = vsyncpa [#allocation4 + $0x1], 1 }
 0x2bd   :  { %2092 = vsyncpa [#allocation5], 1 }
 0x2be   :  { %2094 = vsyncpa [#allocation5 + $0x1], 1 }

</bundles_post_ra>
